<compile_context>
chip_gen: v6e
topology: v6e:2x2x1
jax: 0.10.0
libtpu: 0.0.40
codegen_flags: <defaults>
</compile_context>

<pallas_src>
import functools

import jax
import jax.numpy as jnp
from jax.experimental import pallas as pl
from jax.experimental.pallas import tpu as pltpu


# ------------------------------ Pallas kernels ----------------------------- #
def gcn_layer1_kernel(a_ref, xw_ref, b1_ref, w2_ref, h1w2_ref, acc_ref,
                      *, tk, feat_resident):
    """Per (i, k) step of: h1 = tanh(A @ XW + b1); emits h1 @ W2 (bf16)."""
    k = pl.program_id(1)

    @pl.when(k == 0)
    def _init():
        acc_ref[...] = jnp.zeros_like(acc_ref)

    if feat_resident:
        start = pl.multiple_of(k * tk, tk)
        xw = xw_ref[pl.ds(start, tk), :]          # VMEM-resident slab, sliced
    else:
        xw = xw_ref[...]                          # streamed (tk, 128) tile

    # Neighborhood aggregation: (tm, tk) bf16 @ (tk, 128) bf16 -> f32 acc.
    acc_ref[...] += jnp.dot(a_ref[...], xw, preferred_element_type=jnp.float32)

    @pl.when(k == pl.num_programs(1) - 1)
    def _finalize():
        h1 = jnp.tanh(acc_ref[...] + b1_ref[...])          # f32 (EUP), once/row tile
        # h1 @ W2 computed exactly once per row tile; layer 2 only aggregates.
        h1w2_ref[...] = jnp.dot(
            h1.astype(jnp.bfloat16), w2_ref[...],
            preferred_element_type=jnp.float32,
        ).astype(h1w2_ref.dtype)


def gcn_layer2_kernel(a_ref, hw_ref, b2_ref, wc_ref, bc_ref,
                      out_ref, h2_ref, acc_ref, *, tk, feat_resident):
    """Per (i, k) step of: h2 = tanh(A @ (h1 W2) + b2); out = h2 @ Wc + bc."""
    k = pl.program_id(1)

    @pl.when(k == 0)
    def _init():
        acc_ref[...] = jnp.zeros_like(acc_ref)

    if feat_resident:
        start = pl.multiple_of(k * tk, tk)
        hw = hw_ref[pl.ds(start, tk), :]
    else:
        hw = hw_ref[...]

    acc_ref[...] += jnp.dot(a_ref[...], hw, preferred_element_type=jnp.float32)

    @pl.when(k == pl.num_programs(1) - 1)
    def _finalize():
        h2 = jnp.tanh(acc_ref[...] + b2_ref[...])          # f32
        h2_ref[...] = h2.astype(h2_ref.dtype)              # bf16 writeback
        out_ref[...] = (
            jnp.dot(h2.astype(jnp.bfloat16), wc_ref[...],  # bf16 x bf16, f32 acc
                    preferred_element_type=jnp.float32)
            + bc_ref[...]
        ).astype(out_ref.dtype)


# --------------------------------- wrapper --------------------------------- #
def build_norm_adj(edge_index, num_nodes):
    """Dense D^-1/2 (A + I) D^-1/2, matching PyG GCNConv's default norm.

    Note: duplicate edges are deduplicated (set, not scatter-add); identical to
    PyG for simple graphs such as the test ring graph.
    """
    src, dst = edge_index[0], edge_index[1]
    a = jnp.zeros((num_nodes, num_nodes), jnp.float32)
    a = a.at[dst, src].set(1.0)                              # message src -> dst
    a = a + jnp.eye(num_nodes, dtype=jnp.float32)            # self-loops
    deg = a.sum(axis=1)
    dinv = jnp.where(deg > 0, 1.0 / jnp.sqrt(deg), 0.0)
    return dinv[:, None] * a * dinv[None, :]


def _round_up(x, m):
    return (x + m - 1) // m * m


def _pick_tm(n_pad):
    # Prefer >= 2 row tiles so the "parallel" axis can shard across both
    # v7x TensorCores; v5e/v6e are single-TC so this costs nothing there.
    for c in (1024, 512, 256, 128):
        if n_pad % c == 0 and n_pad // c >= 2:
            return c
    return 128


def _pick_tk(n_pad):
    # 2 MiB-class bf16 A tiles (tm=1024, tk=2048 -> 4 MiB) amortize the
    # ~0.35us per-grid-step overhead on v7x/v6e while staying well inside VMEM.
    for c in (2048, 1024, 512, 256, 128):
        if n_pad % c == 0:
            return c
    return n_pad


def _pad2(a, rows, cols):
    return jnp.zeros((rows, cols), a.dtype).at[: a.shape[0], : a.shape[1]].set(a)


def simple_gcn_forward(x, edge_index, params):
    n, c_in = x.shape
    hidden = params["w1"].shape[1]
    num_class = params["wc"].shape[1]

    # Padding: nodes to a multiple of 128, hidden / num_class to lane-dense 128.
    n_pad = _round_up(n, 128)
    h_pad = _round_up(hidden, 128)
    nc_pad = _round_up(num_class, 128)

    tm = _pick_tm(n_pad)
    tk = _pick_tk(n_pad)
    grid = (n_pad // tm, n_pad // tk)

    # Feature slab (n_pad, 128) bf16 is VMEM-resident when small enough
    # (budget leaves room for 2x buffering + A tiles on v7x's 64 MiB VMEM).
    feat_bytes = n_pad * h_pad * 2
    feat_resident = feat_bytes <= 8 * 1024 * 1024

    # ---- operands: everything fed to the MXU is pre-cast to bf16 ---------- #
    a_bf16 = _pad2(build_norm_adj(edge_index, n), n_pad, n_pad).astype(jnp.bfloat16)

    x_pad = _pad2(x.astype(jnp.float32), n_pad, c_in)
    w1 = _pad2(params["w1"], c_in, h_pad)
    # Tiny prologue: XW = X @ W1 computed once in f32, cast once to bf16.
    xw_bf16 = jnp.dot(x_pad, w1, preferred_element_type=jnp.float32).astype(jnp.bfloat16)

    b1 = _pad2(params["b1"], 1, h_pad)                       # f32 (finalize only)
    w2 = _pad2(params["w2"], h_pad, h_pad).astype(jnp.bfloat16)
    b2 = _pad2(params["b2"], 1, h_pad)                       # f32
    wc = _pad2(params["wc"], h_pad, nc_pad).astype(jnp.bfloat16)
    bc = _pad2(params["bc"], 1, nc_pad)                      # f32

    cparams = pltpu.CompilerParams(
        dimension_semantics=("parallel", "arbitrary"),
        vmem_limit_bytes=48 * 1024 * 1024,
    )

    if feat_resident:
        feat_spec = pl.BlockSpec((n_pad, h_pad), lambda i, k: (0, 0))  # resident
    else:
        feat_spec = pl.BlockSpec((tk, h_pad), lambda i, k: (k, 0))     # streamed

    # ---- layer 1: h1 = tanh(A @ XW + b1);  emit h1 @ W2 (bf16) ------------ #
    h1w2 = pl.pallas_call(
        functools.partial(gcn_layer1_kernel, tk=tk, feat_resident=feat_resident),
        out_shape=jax.ShapeDtypeStruct((n_pad, h_pad), jnp.bfloat16),
        grid_spec=pltpu.PrefetchScalarGridSpec(
            num_scalar_prefetch=0,
            grid=grid,
            in_specs=[
                pl.BlockSpec((tm, tk), lambda i, k: (i, k)),        # A: once/layer
                feat_spec,                                          # XW (bf16)
                pl.BlockSpec((1, h_pad), lambda i, k: (0, 0)),      # b1 resident
                pl.BlockSpec((h_pad, h_pad), lambda i, k: (0, 0)),  # W2 resident
            ],
            out_specs=pl.BlockSpec((tm, h_pad), lambda i, k: (i, 0)),
            scratch_shapes=[pltpu.VMEM((tm, h_pad), jnp.float32)],
        ),
        compiler_params=cparams,
    )(a_bf16, xw_bf16, b1, w2)

    # ---- layer 2 + classifier ---------------------------------------------- #
    out_p, h2_p = pl.pallas_call(
        functools.partial(gcn_layer2_kernel, tk=tk, feat_resident=feat_resident),
        out_shape=(
            jax.ShapeDtypeStruct((n_pad, nc_pad), jnp.float32),     # logits (padded)
            jax.ShapeDtypeStruct((n_pad, h_pad), jnp.bfloat16),     # hidden (padded)
        ),
        grid_spec=pltpu.PrefetchScalarGridSpec(
            num_scalar_prefetch=0,
            grid=grid,
            in_specs=[
                pl.BlockSpec((tm, tk), lambda i, k: (i, k)),        # A again
                feat_spec,                                          # h1 @ W2 (bf16)
                pl.BlockSpec((1, h_pad), lambda i, k: (0, 0)),      # b2 resident
                pl.BlockSpec((h_pad, nc_pad), lambda i, k: (0, 0)), # Wc resident
                pl.BlockSpec((1, nc_pad), lambda i, k: (0, 0)),     # bc resident
            ],
            out_specs=(
                pl.BlockSpec((tm, nc_pad), lambda i, k: (i, 0)),
                pl.BlockSpec((tm, h_pad), lambda i, k: (i, 0)),
            ),
            scratch_shapes=[pltpu.VMEM((tm, h_pad), jnp.float32)],
        ),
        compiler_params=cparams,
    )(a_bf16, h1w2, b2, wc, bc)

    # Slice the lane-density / node padding back off.
    return out_p[:n, :num_class], h2_p[:n, :hidden]


def init_params(key, in_channels, hidden_channels, num_class):
    ks = jax.random.split(key, 6)

    def glorot(k, fan_in, fan_out):
        lim = (6.0 / (fan_in + fan_out)) ** 0.5
        return jax.random.uniform(k, (fan_in, fan_out), jnp.float32, -lim, lim)

    return {
        # GCNConv weights act as x @ W (W: [in, out]); biases kept 2D for TPU layout.
        "w1": glorot(ks[0], in_channels, hidden_channels),
        "b1": 0.1 * jax.random.normal(ks[1], (1, hidden_channels), jnp.float32),
        "w2": glorot(ks[2], hidden_channels, hidden_channels),
        "b2": 0.1 * jax.random.normal(ks[3], (1, hidden_channels), jnp.float32),
        # Linear(hidden, num_class), stored transposed so kernel does h @ Wc.
        "wc": glorot(ks[4], hidden_channels, num_class),
        "bc": 0.1 * jax.random.normal(ks[5], (1, num_class), jnp.float32),
    }


# -------------------------------- reference -------------------------------- #
def simple_gcn_ref(x, edge_index, params):
    a = build_norm_adj(edge_index, x.shape[0])
    h = jnp.tanh(a @ (x @ params["w1"]) + params["b1"])
    h = jnp.tanh(a @ (h @ params["w2"]) + params["b2"])
    out = h @ params["wc"] + params["bc"]
    return out, h


if __name__ == "__main__":
    N, C_IN, HIDDEN, NUM_CLASS = 16, 8, 32, 4

    key = jax.random.PRNGKey(0)
    kx, kp = jax.random.split(key)

    # Deterministic node features and a ring graph (undirected: both directions).
    x = jax.random.normal(kx, (N, C_IN), jnp.float32)
    src = jnp.arange(N, dtype=jnp.int32)
    dst = (src + 1) % N
    edge_index = jnp.stack(
        [jnp.concatenate([src, dst]), jnp.concatenate([dst, src])], axis=0
    )  # [2, 2N]

    params = init_params(kp, C_IN, HIDDEN, NUM_CLASS)

    out, h = simple_gcn_forward(x, edge_index, params)
    jax.block_until_ready((out, h))

    out_ref, h_ref = simple_gcn_ref(x, edge_index, params)
    assert out.shape == (N, NUM_CLASS) and h.shape == (N, HIDDEN)
    # bf16 adjacency / MXU inputs / bf16 h2 writeback with f32 accumulation
    # -> loosened tolerance.
    assert jnp.allclose(out, out_ref, atol=5e-2), "logits mismatch vs reference"
    assert jnp.allclose(h.astype(jnp.float32), h_ref, atol=5e-2), \
        "hidden mismatch vs reference"

    print("KERNEL_OK")
</pallas_src>

<mosaic_0001>
module attributes {stable_mosaic.version = 11 : i64} {
  func.func @gcn_layer1_kernel(%arg0: i32, %arg1: i32, %arg2: memref<128x128xbf16, #tpu.memory_space<vmem>>, %arg3: memref<128x128xbf16, #tpu.memory_space<vmem>>, %arg4: memref<1x128xf32, #tpu.memory_space<vmem>>, %arg5: memref<128x128xbf16, #tpu.memory_space<vmem>>, %arg6: memref<128x128xbf16, #tpu.memory_space<vmem>>, %arg7: memref<128x128xf32, #tpu.memory_space<vmem>>) attributes {dimension_semantics = [#tpu.dimension_semantics<parallel>, #tpu.dimension_semantics<arbitrary>], iteration_bounds = array<i64: 1, 1>, scalar_prefetch = 0 : i64, scratch_operands = 1 : i64, tpu.core_type = #tpu.core_type<tc>, window_params = [{transform_indices = @transform_0, window_bounds = array<i64: 128, 128>}, {pipeline_mode = #tpu.pipeline_mode<synchronous>, transform_indices = @transform_1, window_bounds = array<i64: 128, 128>}, {pipeline_mode = #tpu.pipeline_mode<synchronous>, transform_indices = @transform_2, window_bounds = array<i64: 1, 128>}, {pipeline_mode = #tpu.pipeline_mode<synchronous>, transform_indices = @transform_3, window_bounds = array<i64: 128, 128>}, {transform_indices = @transform_4, window_bounds = array<i64: 128, 128>}]} {
    %c0_i32 = arith.constant 0 : i32
    %0 = arith.cmpi eq, %arg1, %c0_i32 : i32
    %1 = arith.extui %0 : i1 to i32
    %c0_i32_0 = arith.constant 0 : i32
    %2 = arith.cmpi ne, %1, %c0_i32_0 : i32
    scf.if %2 {
      %cst_9 = arith.constant 0.000000e+00 : f32
      %15 = vector.broadcast %cst_9 : f32 to vector<128x128xf32>
      %c0_10 = arith.constant 0 : index
      %c0_11 = arith.constant 0 : index
      %16 = vector.load %arg7[%c0_10, %c0_11] : memref<128x128xf32, #tpu.memory_space<vmem>>, vector<128x128xf32>
      tpu.vector_store %arg7[%c0_10, %c0_11], %15 {strides = array<i32>} : memref<128x128xf32, #tpu.memory_space<vmem>>, vector<128x128xf32>,
    } else {
    }
    %c128_i32 = arith.constant 128 : i32
    %3 = arith.muli %arg1, %c128_i32 : i32
    %4 = tpu.assume_multiple %3, 128 : i32
    %5 = arith.index_cast %4 : i32 to index
    %c0 = arith.constant 0 : index
    %6 = vector.load %arg3[%5, %c0] : memref<128x128xbf16, #tpu.memory_space<vmem>>, vector<128x128xbf16>
    %c0_1 = arith.constant 0 : index
    %c0_2 = arith.constant 0 : index
    %7 = vector.load %arg7[%c0_1, %c0_2] : memref<128x128xf32, #tpu.memory_space<vmem>>, vector<128x128xf32>
    %c0_3 = arith.constant 0 : index
    %c0_4 = arith.constant 0 : index
    %8 = vector.load %arg2[%c0_3, %c0_4] : memref<128x128xbf16, #tpu.memory_space<vmem>>, vector<128x128xbf16>
    %cst = arith.constant dense<0.000000e+00> : vector<128x128xf32>
    %9 = tpu.matmul %8, %6, %cst {dimension_numbers = #tpu.dot_dimension_numbers<[1], [0], [0], [1], [0, 0, 1, 1], [], []>} : vector<128x128xbf16>, vector<128x128xbf16>, vector<128x128xf32> -> vector<128x128xf32>
    %10 = arith.addf %7, %9 : vector<128x128xf32>
    %c0_5 = arith.constant 0 : index
    %c0_6 = arith.constant 0 : index
    %11 = vector.load %arg7[%c0_5, %c0_6] : memref<128x128xf32, #tpu.memory_space<vmem>>, vector<128x128xf32>
    tpu.vector_store %arg7[%c0_5, %c0_6], %10 {strides = array<i32>} : memref<128x128xf32, #tpu.memory_space<vmem>>, vector<128x128xf32>,
    %c0_i32_7 = arith.constant 0 : i32
    %12 = arith.cmpi eq, %arg1, %c0_i32_7 : i32
    %13 = arith.extui %12 : i1 to i32
    %c0_i32_8 = arith.constant 0 : i32
    %14 = arith.cmpi ne, %13, %c0_i32_8 : i32
    scf.if %14 {
      %c0_9 = arith.constant 0 : index
      %c0_10 = arith.constant 0 : index
      %15 = vector.load %arg7[%c0_9, %c0_10] : memref<128x128xf32, #tpu.memory_space<vmem>>, vector<128x128xf32>
      %c0_11 = arith.constant 0 : index
      %c0_12 = arith.constant 0 : index
      %16 = vector.load %arg4[%c0_11, %c0_12] : memref<1x128xf32, #tpu.memory_space<vmem>>, vector<1x128xf32>
      %17 = vector.broadcast %16 : vector<1x128xf32> to vector<128x128xf32>
      %18 = arith.addf %15, %17 : vector<128x128xf32>
      %19 = math.tanh %18 : vector<128x128xf32>
      %20 = arith.truncf %19 : vector<128x128xf32> to vector<128x128xbf16>
      %c0_13 = arith.constant 0 : index
      %c0_14 = arith.constant 0 : index
      %21 = vector.load %arg5[%c0_13, %c0_14] : memref<128x128xbf16, #tpu.memory_space<vmem>>, vector<128x128xbf16>
      %cst_15 = arith.constant dense<0.000000e+00> : vector<128x128xf32>
      %22 = tpu.matmul %20, %21, %cst_15 {dimension_numbers = #tpu.dot_dimension_numbers<[1], [0], [0], [1], [0, 0, 1, 1], [], []>} : vector<128x128xbf16>, vector<128x128xbf16>, vector<128x128xf32> -> vector<128x128xf32>
      %23 = arith.truncf %22 : vector<128x128xf32> to vector<128x128xbf16>
      %c0_16 = arith.constant 0 : index
      %c0_17 = arith.constant 0 : index
      %24 = vector.load %arg6[%c0_16, %c0_17] : memref<128x128xbf16, #tpu.memory_space<vmem>>, vector<128x128xbf16>
      tpu.vector_store %arg6[%c0_16, %c0_17], %23 {strides = array<i32>} : memref<128x128xbf16, #tpu.memory_space<vmem>>, vector<128x128xbf16>,
    } else {
    }
    return
  }
  func.func @transform_0(%arg0: i32, %arg1: i32) -> (i32, i32) {
    %c0_i32 = arith.constant 0 : i32
    return %arg0, %arg1 : i32, i32
  }
  func.func @transform_1(%arg0: i32, %arg1: i32) -> (i32, i32) {
    %c0_i32 = arith.constant 0 : i32
    %c0_i32_0 = arith.constant 0 : i32
    %c0_i32_1 = arith.constant 0 : i32
    return %c0_i32, %c0_i32_0 : i32, i32
  }
  func.func @transform_2(%arg0: i32, %arg1: i32) -> (i32, i32) {
    %c0_i32 = arith.constant 0 : i32
    %c0_i32_0 = arith.constant 0 : i32
    %c0_i32_1 = arith.constant 0 : i32
    return %c0_i32, %c0_i32_0 : i32, i32
  }
  func.func @transform_3(%arg0: i32, %arg1: i32) -> (i32, i32) {
    %c0_i32 = arith.constant 0 : i32
    %c0_i32_0 = arith.constant 0 : i32
    %c0_i32_1 = arith.constant 0 : i32
    return %c0_i32, %c0_i32_0 : i32, i32
  }
  func.func @transform_4(%arg0: i32, %arg1: i32) -> (i32, i32) {
    %c0_i32 = arith.constant 0 : i32
    %c0_i32_0 = arith.constant 0 : i32
    return %arg0, %c0_i32 : i32, i32
  }
}

</mosaic_0001>

<bundles_post_ra>
// kernel: tpu_custom_call.1
= control target key start
LH: loop header
LB: loop body
LE: loop exit
PB: predicated region body
PF: predicated region fallthrough
CT: control target
= control target key end

     0   :  { %9 = vsyncpa [#allocation4], 0  ;;  %s1091_s0 = inlined_call_operand.hbm [shape: bf16[128,128], index: 0, kind: input, shape index: {}]   ;;  %s1092_s1 = inlined_call_operand.hbm [shape: bf16[128,128], index: 1, kind: input, shape index: {}]   ;;  %s1093_s2 = inlined_call_operand.vmem [shape: f32[1,128], index: 2, kind: input, shape index: {}]   ;;  %s1094_s3 = inlined_call_operand.hbm [shape: bf16[128,128], index: 3, kind: input, shape index: {}]   ;;  %s1095_s4 = inlined_call_operand.hbm [shape: bf16[128,128], index: 4, kind: output, shape index: {}]  }
   0x1   :  { %10 = vsyncpa [#allocation7], 0 }
   0x2   :  { %11 = vsyncpa [#allocation5], 0  ;;  %s1033_s15 = smov [#allocation6]   ;;  %s1034_s17 = smov [#allocation3]  }
   0x3   :  { %s29_s16 = sshll.u32 %s1033_s15, 4  ;;  %s17_s18 = sshll.u32 %s1034_s17, 4  ;;  %s30_s16 = int_to_ptr.vmem [resolvable:$true] %s29_s16  ;;  %s18_s18 = int_to_ptr.vmem [resolvable:$true] %s17_s18 }
   0x4   :  { %s955_s19 = scalar_lea.vmem %s30_s16, 1024  ;;  %p960_p1 = scmp.lt.s32.totalorder %s30_s16, %s30_s16 }
   0x5   :  { %p956_p0 = scmp.ne.s32.totalorder %s30_s16, %s955_s19  ;;  %p961_p2 = scmp.lt.s32.totalorder %s955_s19, %s955_s19 }
   0x7   :  { %p962_p3 = por %p961_p2, %p960_p1 }
   0x9   :  { %p963_p4 = pnand %p962_p3, %p956_p0 }
   0xb   :  { %966 = shalt.err (!%p963_p4)
}
   0xc   :  { %s1035_s20 = smov 64   ;;  %s1036_s21 = smov 4  }
   0xd   :  { %35 = dma.hbm_to_vmem [thread:$0]  %s1092_s1, 1024, %s30_s16, [#allocation7], %s1035_s20, %s1035_s20, %s1036_s21  }
   0xe   :  { %s975_s24 = scalar_lea.vmem %s18_s18, 1024  ;;  %p980_p6 = scmp.lt.s32.totalorder %s18_s18, %s18_s18 }
   0xf   :  { %p976_p5 = scmp.ne.s32.totalorder %s18_s18, %s975_s24  ;;  %p981_p7 = scmp.lt.s32.totalorder %s975_s24, %s975_s24 }
  0x11   :  { %p982_p8 = por %p981_p7, %p980_p6 }
  0x13   :  { %p983_p9 = pnand %p982_p8, %p976_p5 }
  0x15   :  { %986 = shalt.err (!%p983_p9)
}
  0x16   :  { %23 = dma.hbm_to_vmem [thread:$0]  %s1091_s0, 1024, %s18_s18, [#allocation4], %s1035_s20, %s1035_s20, %s1036_s21  }
  0x17   :  { %s1037_s27 = smov [#allocation8]  }
  0x18   :  { %s43_s28 = sshll.u32 %s1037_s27, 4  ;;  %s44_s28 = int_to_ptr.vmem [resolvable:$true] %s43_s28 }
  0x19   :  { %s995_s29 = scalar_lea.vmem %s44_s28, 1024  ;;  %p1000_p11 = scmp.lt.s32.totalorder %s44_s28, %s44_s28 }
  0x1a   :  { %p996_p10 = scmp.ne.s32.totalorder %s44_s28, %s995_s29  ;;  %p1001_p12 = scmp.lt.s32.totalorder %s995_s29, %s995_s29 }
  0x1c   :  { %p1002_p13 = por %p1001_p12, %p1000_p11 }
  0x1e   :  { %p1003_p0 = pnand %p1002_p13, %p996_p10 }
  0x20   :  { %1006 = shalt.err (!%p1003_p0)
}
  0x21   :  { %49 = dma.hbm_to_vmem [thread:$0]  %s1094_s3, 1024, %s44_s28, [#allocation7], %s1035_s20, %s1035_s20, %s1036_s21  }
  0x22   :  { %1027 = dma.done.wait [#allocation4], 1024  }
  0x23   :  { %1028 = vsyncadd [#allocation4], 4294966272 }
  0x24   :  { %1029 = dma.done.wait [#allocation7], 2048  }
  0x25   :  { %1030 = vsyncadd [#allocation7], 4294965248  ;;  %v891_v0 = vld [vmem:[#allocation6 + $0x38] sm:$0xff]   ;;  %v892_v1 = vld [vmem:[#allocation6 + $0x30] sm:$0xff]  }
  0x26   :  { %821 = vmatprep.subr.bf16.mxu0 %v891_v0  ;;  %v893_v2 = vld [vmem:[#allocation6 + $0x28] sm:$0xff]   ;;  %v894_v3 = vld [vmem:[#allocation6 + $0x20] sm:$0xff]   ;;  %v895_v5 = vld [vmem:[#allocation6 + $0x18] sm:$0xff]  }
  0x27   :  { %822 = vmatpush3.bf16.msra.mxu0 %v891_v0  ;;  %v899_v4 = vld [vmem:[#allocation3] sm:$0xff]   ;;  %v896_v6 = vld [vmem:[#allocation6 + $0x10] sm:$0xff]   ;;  %v907_v7 = vld [vmem:[#allocation8 + $0x38] sm:$0xff]  }
  0x28   :  { %823 = vmatprep.subr.bf16.mxu0 %v892_v1  ;;  %837 = vmatprep.mubr.bf16.mxu0 %v899_v4  ;;  %v908_v8 = vld [vmem:[#allocation8 + $0x30] sm:$0xff]   ;;  %v897_v9 = vld [vmem:[#allocation6 + $0x8] sm:$0xff]   ;;  %v898_v10 = vld [vmem:[#allocation6] sm:$0xff]  }
  0x29   :  { %853 = vmatprep.subr.bf16.mxu1 %v907_v7  ;;  %v900_v11 = vld [vmem:[#allocation3 + $0x8] sm:$0xff]   ;;  %v901_v12 = vld [vmem:[#allocation3 + $0x10] sm:$0xff]   ;;  %v902_v13 = vld [vmem:[#allocation3 + $0x18] sm:$0xff]  }
  0x2a   :  { %854 = vmatpush3.bf16.msra.mxu1 %v907_v7  ;;  %v903_v14 = vld [vmem:[#allocation3 + $0x20] sm:$0xff]   ;;  %v904_v15 = vld [vmem:[#allocation3 + $0x28] sm:$0xff]   ;;  %v905_v16 = vld [vmem:[#allocation3 + $0x30] sm:$0xff]  }
  0x2b   :  { %824 = vmatpush3.bf16.msra.mxu0 %v892_v1  ;;  %855 = vmatprep.subr.bf16.mxu1 %v908_v8  ;;  %v906_v17 = vld [vmem:[#allocation3 + $0x38] sm:$0xff]   ;;  %v909_v18 = vld [vmem:[#allocation8 + $0x28] sm:$0xff]   ;;  %v910_v19 = vld [vmem:[#allocation8 + $0x20] sm:$0xff]  }
  0x2c   :  { %825 = vmatprep.subr.bf16.mxu0 %v893_v2  ;;  %v911_v20 = vld [vmem:[#allocation8 + $0x18] sm:$0xff]   ;;  %v912_v21 = vld [vmem:[#allocation8 + $0x10] sm:$0xff]   ;;  %v913_v22 = vld [vmem:[#allocation8 + $0x8] sm:$0xff]  }
  0x2d   :  { %v914_v23 = vld [vmem:[#allocation8] sm:$0xff]  }
  0x2e   :  { %856 = vmatpush3.bf16.msra.mxu1 %v908_v8  ;;  %v701_v25 = vld [vmem:[%s1093_s2] ss:$0 sm:$0xff]  ;;  %s1038_s2 = smov [#allocation9]  }
  0x2f   :  { %826 = vmatpush3.bf16.msra.mxu0 %v893_v2  ;;  %857 = vmatprep.subr.bf16.mxu1 %v909_v18  ;;  %s670_s5 = sshll.u32 %s1038_s2, 4  ;;  %s671_s5 = int_to_ptr.vmem [resolvable:$true] %s670_s5 }
  0x30   :  { %827 = vmatprep.subr.bf16.mxu0 %v894_v3  ;;  %s1007_s6 = scalar_lea.vmem %s671_s5, 1024  ;;  %p1012_p2 = scmp.lt.s32.totalorder %s671_s5, %s671_s5 }
  0x31   :  { %p1008_p1 = scmp.ne.s32.totalorder %s671_s5, %s1007_s6  ;;  %p1013_p3 = scmp.lt.s32.totalorder %s1007_s6, %s1007_s6 }
  0x32   :  { %858 = vmatpush3.bf16.msra.mxu1 %v909_v18 }
  0x33   :  { %828 = vmatpush3.bf16.msra.mxu0 %v894_v3  ;;  %859 = vmatprep.subr.bf16.mxu1 %v910_v19  ;;  %p1014_p4 = por %p1013_p3, %p1012_p2 }
  0x34   :  { %829 = vmatprep.subr.bf16.mxu0 %v895_v5 }
  0x35   :  { %p1015_p5 = pnand %p1014_p4, %p1008_p1 }
  0x36   :  { %860 = vmatpush3.bf16.msra.mxu1 %v910_v19 }
  0x37   :  { %830 = vmatpush3.bf16.msra.mxu0 %v895_v5  ;;  %861 = vmatprep.subr.bf16.mxu1 %v911_v20 }
  0x38   :  { %831 = vmatprep.subr.bf16.mxu0 %v896_v6 }
  0x3a   :  { %862 = vmatpush3.bf16.msra.mxu1 %v911_v20 }
  0x3b   :  { %832 = vmatpush3.bf16.msra.mxu0 %v896_v6  ;;  %863 = vmatprep.subr.bf16.mxu1 %v912_v21 }
  0x3c   :  { %833 = vmatprep.subr.bf16.mxu0 %v897_v9 }
  0x3e   :  { %864 = vmatpush3.bf16.msra.mxu1 %v912_v21 }
  0x3f   :  { %834 = vmatpush3.bf16.msra.mxu0 %v897_v9  ;;  %865 = vmatprep.subr.bf16.mxu1 %v913_v22 }
  0x40   :  { %835 = vmatprep.subr.bf16.mxu0 %v898_v10 }
  0x42   :  { %866 = vmatpush3.bf16.msra.mxu1 %v913_v22 }
  0x43   :  { %836 = vmatpush3.bf16.msra.mxu0 %v898_v10  ;;  %867 = vmatprep.subr.bf16.mxu1 %v914_v23 }
  0x46   :  { %838 = vmatmul.mubr.bf16.vlgmr.msra.gmra.mxu0 %v900_v11  ;;  %868 = vmatpush3.bf16.msra.mxu1 %v914_v23 }
  0x47   :  { %841 = vmatprep.mubr.bf16.mxu0 %v901_v12 }
  0x4e   :  { %842 = vmatmul.mubr.bf16.gmra.mxu0 %v902_v13 }
  0x4f   :  { %845 = vmatprep.mubr.bf16.mxu0 %v903_v14 }
  0x56   :  { %846 = vmatmul.mubr.bf16.gmra.mxu0 %v904_v15 }
  0x57   :  { %849 = vmatprep.mubr.bf16.mxu0 %v905_v16 }
  0x5e   :  { %850 = vmatmul.mubr.bf16.gmra.mxu0 %v906_v17 }
 0x106   :  { %v839_v24 = vpop.f32.mrf.mxu0 }
 0x107   :  { %v386_v30 = vadd.f32 %v839_v24, %v701_v25 }
 0x108   :  { %v263_v26 = vpop.f32.mrf.mxu0 }
 0x109   :  { %v384_v27 = vadd.f32 %v701_v25, %v263_v26 }
 0x10a   :  { %v840_v28 = vpop.f32.mrf.mxu0 }
 0x10b   :  { %v387_v29 = vadd.f32 %v840_v28, %v701_v25  ;;  %915 = vtanh.f32 %v384_v27 }
 0x10c   :  { %v266_v31 = vpop.f32.mrf.mxu0 }
 0x10d   :  { %v385_v32 = vadd.f32 %v701_v25, %v266_v31  ;;  %917 = vtanh.f32 %v387_v29 }
 0x10e   :  { %v843_v33 = vpop.f32.mrf.mxu0 }
 0x10f   :  { %919 = vtanh.f32 %v385_v32  ;;  %v390_v38 = vadd.f32 %v843_v33, %v701_v25 }
 0x110   :  { %921 = vtanh.f32 %v386_v30  ;;  %v279_v34 = vpop.f32.mrf.mxu0 }
 0x111   :  { %v388_v35 = vadd.f32 %v701_v25, %v279_v34 }
 0x112   :  { %v844_v36 = vpop.f32.mrf.mxu0 }
 0x113   :  { %v391_v37 = vadd.f32 %v844_v36, %v701_v25  ;;  %923 = vtanh.f32 %v388_v35 }
 0x114   :  { %v282_v39 = vpop.f32.mrf.mxu0 }
 0x115   :  { %v389_v40 = vadd.f32 %v701_v25, %v282_v39  ;;  %925 = vtanh.f32 %v391_v37 }
 0x116   :  { %v847_v41 = vpop.f32.mrf.mxu0 }
 0x117   :  { %927 = vtanh.f32 %v389_v40  ;;  %v394_v49 = vadd.f32 %v847_v41, %v701_v25 }
 0x118   :  { %929 = vtanh.f32 %v390_v38  ;;  %v295_v42 = vpop.f32.mrf.mxu0  ;;  %v916_v44 = vpop.eup %915 }
 0x119   :  { %v392_v43 = vadd.f32 %v701_v25, %v295_v42 }
 0x11a   :  { %v848_v45 = vpop.f32.mrf.mxu0  ;;  %v918_v46 = vpop.eup %917 }
 0x11b   :  { %v395_v47 = vadd.f32 %v848_v45, %v701_v25  ;;  %931 = vtanh.f32 %v392_v43 }
 0x11c   :  { %v920_v48 = vpop.eup %919  ;;  %v298_v50 = vpop.f32.mrf.mxu0 }
 0x11d   :  { %v922_v51 = vpop.eup %921  ;;  %v393_v52 = vadd.f32 %v701_v25, %v298_v50  ;;  %v416_v53 = vpack.c.bf16 %v920_v48, %v916_v44  ;;  %933 = vtanh.f32 %v395_v47 }
 0x11e   :  { %v851_v54 = vpop.f32.mrf.mxu0  ;;  %v417_v55 = vpack.c.bf16 %v918_v46, %v922_v51 }
 0x11f   :  { %935 = vtanh.f32 %v393_v52  ;;  %869 = vmatprep.mubr.bf16.mxu1 %v416_v53  ;;  %v398_v63 = vadd.f32 %v851_v54, %v701_v25 }
 0x120   :  { %937 = vtanh.f32 %v394_v49  ;;  %v311_v56 = vpop.f32.mrf.mxu0  ;;  %870 = vmatmul.mubr.bf16.vlgmr.msra.gmra.mxu1 %v417_v55  ;;  %v924_v58 = vpop.eup %923 }
 0x121   :  { %v396_v57 = vadd.f32 %v701_v25, %v311_v56 }
 0x122   :  { %v852_v59 = vpop.f32.mrf.mxu0  ;;  %v926_v60 = vpop.eup %925 }
 0x123   :  { %v399_v61 = vadd.f32 %v852_v59, %v701_v25  ;;  %939 = vtanh.f32 %v396_v57 }
 0x124   :  { %v928_v62 = vpop.eup %927  ;;  %v314_v0 = vpop.f32.mrf.mxu0 }
 0x125   :  { %v930_v1 = vpop.eup %929  ;;  %v397_v2 = vadd.f32 %v701_v25, %v314_v0  ;;  %v418_v3 = vpack.c.bf16 %v928_v62, %v924_v58  ;;  %941 = vtanh.f32 %v399_v61 }
 0x126   :  { %v419_v4 = vpack.c.bf16 %v926_v60, %v930_v1 }
 0x127   :  { %943 = vtanh.f32 %v397_v2  ;;  %873 = vmatprep.mubr.bf16.mxu1 %v418_v3 }
 0x128   :  { %945 = vtanh.f32 %v398_v63  ;;  %874 = vmatmul.mubr.bf16.gmra.mxu1 %v419_v4  ;;  %v932_v5 = vpop.eup %931 }
 0x12a   :  { %v934_v6 = vpop.eup %933 }
 0x12c   :  { %v936_v7 = vpop.eup %935 }
 0x12d   :  { %v938_v8 = vpop.eup %937  ;;  %v420_v9 = vpack.c.bf16 %v936_v7, %v932_v5 }
 0x12e   :  { %v421_v10 = vpack.c.bf16 %v934_v6, %v938_v8 }
 0x12f   :  { %877 = vmatprep.mubr.bf16.mxu1 %v420_v9 }
 0x130   :  { %878 = vmatmul.mubr.bf16.gmra.mxu1 %v421_v10  ;;  %v940_v11 = vpop.eup %939 }
 0x132   :  { %v942_v12 = vpop.eup %941 }
 0x134   :  { %v944_v13 = vpop.eup %943 }
 0x135   :  { %v946_v14 = vpop.eup %945  ;;  %v422_v15 = vpack.c.bf16 %v944_v13, %v940_v11 }
 0x136   :  { %v423_v16 = vpack.c.bf16 %v942_v12, %v946_v14 }
 0x137   :  { %881 = vmatprep.mubr.bf16.mxu1 %v422_v15 }
 0x138   :  { %882 = vmatmul.mubr.bf16.gmra.mxu1 %v423_v16 }
 0x1e0   :  { %v871_v17 = vpop.f32.mrf.mxu1 }
 0x1e2   :  { %v522_v18 = vpop.f32.mrf.mxu1 }
 0x1e4   :  { %v872_v19 = vpop.f32.mrf.mxu1 }
 0x1e5   :  { %v750_v20 = vpack.c.bf16 %v872_v19, %v871_v17 }
 0x1e6   :  { %v525_v21 = vpop.f32.mrf.mxu1 }
 0x1e7   :  { %782 = vst [vmem:[#allocation9 + $0x8] sm:$0xff] %v750_v20   ;;  %v745_v22 = vpack.c.bf16 %v525_v21, %v522_v18 }
 0x1e8   :  { %v875_v23 = vpop.f32.mrf.mxu1 }
 0x1e9   :  { %746 = vst [vmem:[#allocation9] sm:$0xff] %v745_v22  }
 0x1ea   :  { %v538_v24 = vpop.f32.mrf.mxu1 }
 0x1ec   :  { %v876_v25 = vpop.f32.mrf.mxu1 }
 0x1ed   :  { %v760_v26 = vpack.c.bf16 %v876_v25, %v875_v23 }
 0x1ee   :  { %v541_v27 = vpop.f32.mrf.mxu1 }
 0x1ef   :  { %784 = vst [vmem:[#allocation9 + $0x18] sm:$0xff] %v760_v26   ;;  %v755_v28 = vpack.c.bf16 %v541_v27, %v538_v24 }
 0x1f0   :  { %v879_v29 = vpop.f32.mrf.mxu1 }
 0x1f1   :  { %783 = vst [vmem:[#allocation9 + $0x10] sm:$0xff] %v755_v28  }
 0x1f2   :  { %v554_v30 = vpop.f32.mrf.mxu1 }
 0x1f4   :  { %v880_v31 = vpop.f32.mrf.mxu1 }
 0x1f5   :  { %v770_v32 = vpack.c.bf16 %v880_v31, %v879_v29 }
 0x1f6   :  { %v557_v33 = vpop.f32.mrf.mxu1 }
 0x1f7   :  { %786 = vst [vmem:[#allocation9 + $0x28] sm:$0xff] %v770_v32   ;;  %v765_v34 = vpack.c.bf16 %v557_v33, %v554_v30 }
 0x1f8   :  { %v883_v35 = vpop.f32.mrf.mxu1 }
 0x1f9   :  { %785 = vst [vmem:[#allocation9 + $0x20] sm:$0xff] %v765_v34  }
 0x1fa   :  { %v570_v36 = vpop.f32.mrf.mxu1 }
 0x1fc   :  { %v884_v37 = vpop.f32.mrf.mxu1 }
 0x1fd   :  { %v780_v38 = vpack.c.bf16 %v884_v37, %v883_v35 }
 0x1fe   :  { %v573_v39 = vpop.f32.mrf.mxu1 }
 0x1ff   :  { %788 = vst [vmem:[#allocation9 + $0x38] sm:$0xff] %v780_v38   ;;  %v775_v40 = vpack.c.bf16 %v573_v39, %v570_v36 }
 0x201   :  { %787 = vst [vmem:[#allocation9 + $0x30] sm:$0xff] %v775_v40  }
 0x202   :  { %1018 = shalt.err (!%p1015_p5)
}
 0x203   :  { %676 = dma.vmem_to_hbm [thread:$0]  %s671_s5, 1024, %s1095_s4, [#allocation5], %s1035_s20, %s1035_s20, %s1036_s21  }
 0x204   :  { %1031 = dma.done.wait [#allocation5], 1024  }
 0x205   :  { %1032 = vsyncadd [#allocation5], 4294966272 }
 0x206   :  { %680 = vsyncpa [#allocation4], 1 }
 0x207   :  { %681 = vsyncpa [#allocation7], 1 }
 0x208   :  { %682 = vsyncpa [#allocation5], 1 }

</bundles_post_ra>
